<compile_context>
chip_gen: v5e
topology: v5e:2x2
jax: 0.10.0
libtpu: 0.0.40
codegen_flags: <defaults>
</compile_context>

<pallas_src>
import jax
import jax.numpy as jnp
from jax.experimental import pallas as pl
from jax.experimental.pallas import tpu as pltpu


def _round_up(x, m):
    return (x + m - 1) // m * m


def _pick_tile(size, max_tile, unit=128):
    """Largest multiple of `unit` that divides `size` and is <= max_tile."""
    best = min(unit, size)
    t = unit
    while t <= min(size, max_tile):
        if size % t == 0:
            best = t
        t += unit
    return best


# --------------------------------------------------------------------------
# Kernel 1: rank-r down projection  z = x @ A   (A pre-transposed to (in, r))
# Grid = (M tiles, K tiles), K innermost; f32 accumulator in VMEM.
# --------------------------------------------------------------------------
def _lora_down_kernel(x_ref, a_ref, z_ref, acc_ref):
    k = pl.program_id(1)

    @pl.when(k == 0)
    def _():
        acc_ref[...] = jnp.zeros_like(acc_ref)

    acc_ref[...] += jnp.dot(x_ref[...], a_ref[...],
                            preferred_element_type=jnp.float32)

    @pl.when(k == pl.num_programs(1) - 1)
    def _():
        z_ref[...] = acc_ref[...].astype(z_ref.dtype)


# --------------------------------------------------------------------------
# Kernel 2: out = x @ W + bias + z @ B   (W,B pre-transposed to (in, out))
# Grid = (M tiles, N tiles, K tiles), K innermost; f32 accumulator in VMEM.
# z is precomputed, so both M and N axes are independent ("parallel").
# --------------------------------------------------------------------------
def _lora_main_kernel(x_ref, w_ref, bias_ref, z_ref, b_ref, o_ref, acc_ref):
    k = pl.program_id(2)

    @pl.when(k == 0)
    def _():
        acc_ref[...] = jnp.zeros_like(acc_ref)

    acc_ref[...] += jnp.dot(x_ref[...], w_ref[...],
                            preferred_element_type=jnp.float32)

    @pl.when(k == pl.num_programs(2) - 1)
    def _():
        lora = jnp.dot(z_ref[...], b_ref[...],
                       preferred_element_type=jnp.float32)
        # TODO(synk): train-mode dropout would mask `lora` here.
        o_ref[...] = (acc_ref[...] + bias_ref[...].astype(jnp.float32) + lora
                      ).astype(o_ref.dtype)


# --------------------------------------------------------------------------
# Wrapper
# --------------------------------------------------------------------------
def prepare_lora_weights(w_orig, b_orig, a_w, b_w, compute_dtype=jnp.float32):
    """Pad + transpose adapter weights ONCE (hoisted out of the forward path).

    w_orig: (H, H)   original_layer.weight
    b_orig: (H,)     original_layer.bias
    a_w:    (r, H)   A.weight
    b_w:    (H, r)   B.weight
    """
    H = w_orig.shape[0]
    r = a_w.shape[0]
    H_pad = _round_up(H, 128)
    R_pad = _round_up(r, 128)

    w_t = jnp.pad(w_orig.T, ((0, H_pad - H), (0, H_pad - H))).astype(compute_dtype)  # (in, out)
    a_t = jnp.pad(a_w.T, ((0, H_pad - H), (0, R_pad - r))).astype(compute_dtype)     # (in, r)
    b_t = jnp.pad(b_w.T, ((0, R_pad - r), (0, H_pad - H))).astype(compute_dtype)     # (r, out)
    bias = jnp.pad(b_orig.reshape(1, H), ((0, 0), (0, H_pad - H))).astype(jnp.float32)

    return dict(w_t=w_t, a_t=a_t, b_t=b_t, bias=bias,
                H=H, r=r, H_pad=H_pad, R_pad=R_pad,
                compute_dtype=compute_dtype)


def lora_forward(x, params, *, max_tm=512, max_tn=512, max_tk=1024,
                 vmem_limit_bytes=48 * 1024 * 1024):
    """LoRAAdapter.forward: original_layer(x) + dropout(B(A(x)))  (eval mode)."""
    H = params["H"]
    H_pad = params["H_pad"]
    R_pad = params["R_pad"]
    cdt = params["compute_dtype"]

    orig_shape = x.shape
    out_dtype = x.dtype
    x2d = x.reshape(-1, H)
    M = x2d.shape[0]

    # Lane/sublane-aligned tiles that exactly divide the padded dims.
    TM = min(max_tm, _round_up(M, 8))
    TN = _pick_tile(H_pad, max_tn)
    TK = _pick_tile(H_pad, max_tk)
    M_pad = _round_up(M, TM)

    x_p = jnp.pad(x2d, ((0, M_pad - M), (0, H_pad - H))).astype(cdt)

    # ---- pass 1: z = x @ A  (small, one sweep over K per M tile) -----------
    z = pl.pallas_call(
        _lora_down_kernel,
        out_shape=jax.ShapeDtypeStruct((M_pad, R_pad), cdt),
        grid_spec=pltpu.PrefetchScalarGridSpec(
            num_scalar_prefetch=0,
            grid=(M_pad // TM, H_pad // TK),
            in_specs=[
                pl.BlockSpec((TM, TK), lambda i, k: (i, k)),      # x
                pl.BlockSpec((TK, R_pad), lambda i, k: (k, 0)),   # A (in, r)
            ],
            out_specs=pl.BlockSpec((TM, R_pad), lambda i, k: (i, 0)),
            scratch_shapes=[pltpu.VMEM((TM, R_pad), jnp.float32)],
        ),
        compiler_params=pltpu.CompilerParams(
            dimension_semantics=("parallel", "arbitrary"),
            vmem_limit_bytes=vmem_limit_bytes,
        ),
    )(x_p, params["a_t"])

    # ---- pass 2: out = x @ W + bias + z @ B --------------------------------
    out = pl.pallas_call(
        _lora_main_kernel,
        out_shape=jax.ShapeDtypeStruct((M_pad, H_pad), out_dtype),
        grid_spec=pltpu.PrefetchScalarGridSpec(
            num_scalar_prefetch=0,
            grid=(M_pad // TM, H_pad // TN, H_pad // TK),
            in_specs=[
                pl.BlockSpec((TM, TK), lambda i, j, k: (i, k)),     # x
                pl.BlockSpec((TK, TN), lambda i, j, k: (k, j)),     # W (in,out)
                pl.BlockSpec((1, TN), lambda i, j, k: (0, j)),      # bias
                pl.BlockSpec((TM, R_pad), lambda i, j, k: (i, 0)),  # z
                pl.BlockSpec((R_pad, TN), lambda i, j, k: (0, j)),  # B (r,out)
            ],
            out_specs=pl.BlockSpec((TM, TN), lambda i, j, k: (i, j)),
            scratch_shapes=[pltpu.VMEM((TM, TN), jnp.float32)],
        ),
        compiler_params=pltpu.CompilerParams(
            # z is precomputed -> no cross-j state, so both i and j can be
            # split across TensorCores (v7x megacore helps even for small M).
            dimension_semantics=("parallel", "parallel", "arbitrary"),
            vmem_limit_bytes=vmem_limit_bytes,
        ),
    )(x_p, params["w_t"], params["bias"], z, params["b_t"])

    return out[:M, :H].reshape(orig_shape)


if __name__ == "__main__":
    # Small shapes implied by the module: sequence-style Linear input.
    batch, seq, hidden, r = 2, 8, 32, 4

    key = jax.random.PRNGKey(0)
    k_x, k_w, k_b, k_a, k_bw = jax.random.split(key, 5)

    x = jax.random.normal(k_x, (batch, seq, hidden), dtype=jnp.float32)

    # original_layer: Linear(hidden, hidden)
    w_orig = jax.random.normal(k_w, (hidden, hidden), dtype=jnp.float32) * 0.1
    b_orig = jax.random.normal(k_b, (hidden,), dtype=jnp.float32) * 0.1
    # A: Linear(hidden, r, bias=False) -> weight (r, hidden)
    a_w = jax.random.normal(k_a, (r, hidden), dtype=jnp.float32) * 0.1

    hp = jax.lax.Precision.HIGHEST

    def reference(x, w, b, a, bw):
        orig = jnp.dot(x, w.T, precision=hp) + b
        lora = jnp.dot(jnp.dot(x, a.T, precision=hp), bw.T, precision=hp)
        return orig + lora  # eval-mode dropout == identity

    # The module zero-inits B; also check a non-zero B so the LoRA path is
    # genuinely exercised (with B == 0 its contribution is identically zero).
    b_candidates = (
        jnp.zeros((hidden, r), dtype=jnp.float32),
        jax.random.normal(k_bw, (hidden, r), dtype=jnp.float32) * 0.1,
    )

    for b_w in b_candidates:
        params = prepare_lora_weights(w_orig, b_orig, a_w, b_w)   # hoisted, once
        out = jax.block_until_ready(lora_forward(x, params))
        ref = reference(x, w_orig, b_orig, a_w, b_w)
        # Tolerance covers possible multi-pass MXU rounding of f32 matmuls.
        assert jnp.allclose(out, ref, atol=5e-3, rtol=5e-3), "f32 path mismatch"

    # bf16 compute path (the perf-relevant configuration on v6e/v7x).
    params_bf16 = prepare_lora_weights(w_orig, b_orig, a_w, b_candidates[1],
                                       compute_dtype=jnp.bfloat16)
    out_bf16 = jax.block_until_ready(lora_forward(x, params_bf16))
    ref = reference(x, w_orig, b_orig, a_w, b_candidates[1])
    assert jnp.allclose(out_bf16.astype(jnp.float32), ref,
                        atol=3e-2, rtol=3e-2), "bf16 path mismatch"

    print("KERNEL_OK")
</pallas_src>

<mosaic_0001>
module attributes {stable_mosaic.version = 11 : i64} {
  func.func @_lora_down_kernel(%arg0: i32, %arg1: i32, %arg2: memref<16x128xf32, #tpu.memory_space<vmem>>, %arg3: memref<128x128xf32, #tpu.memory_space<vmem>>, %arg4: memref<16x128xf32, #tpu.memory_space<vmem>>, %arg5: memref<16x128xf32, #tpu.memory_space<vmem>>) attributes {dimension_semantics = [#tpu.dimension_semantics<parallel>, #tpu.dimension_semantics<arbitrary>], iteration_bounds = array<i64: 1, 1>, scalar_prefetch = 0 : i64, scratch_operands = 1 : i64, tpu.core_type = #tpu.core_type<tc>, window_params = [{transform_indices = @transform_0, window_bounds = array<i64: 16, 128>}, {transform_indices = @transform_1, window_bounds = array<i64: 128, 128>}, {transform_indices = @transform_2, window_bounds = array<i64: 16, 128>}]} {
    %c0_i32 = arith.constant 0 : i32
    %0 = arith.cmpi eq, %arg1, %c0_i32 : i32
    %1 = arith.extui %0 : i1 to i32
    %c0_i32_0 = arith.constant 0 : i32
    %2 = arith.cmpi ne, %1, %c0_i32_0 : i32
    scf.if %2 {
      %cst_10 = arith.constant 0.000000e+00 : f32
      %12 = vector.broadcast %cst_10 : f32 to vector<16x128xf32>
      %c0_11 = arith.constant 0 : index
      %c0_12 = arith.constant 0 : index
      %13 = vector.load %arg5[%c0_11, %c0_12] : memref<16x128xf32, #tpu.memory_space<vmem>>, vector<16x128xf32>
      tpu.vector_store %arg5[%c0_11, %c0_12], %12 {strides = array<i32>} : memref<16x128xf32, #tpu.memory_space<vmem>>, vector<16x128xf32>,
    } else {
    }
    %c0 = arith.constant 0 : index
    %c0_1 = arith.constant 0 : index
    %3 = vector.load %arg5[%c0, %c0_1] : memref<16x128xf32, #tpu.memory_space<vmem>>, vector<16x128xf32>
    %c0_2 = arith.constant 0 : index
    %c0_3 = arith.constant 0 : index
    %4 = vector.load %arg2[%c0_2, %c0_3] : memref<16x128xf32, #tpu.memory_space<vmem>>, vector<16x128xf32>
    %c0_4 = arith.constant 0 : index
    %c0_5 = arith.constant 0 : index
    %5 = vector.load %arg3[%c0_4, %c0_5] : memref<128x128xf32, #tpu.memory_space<vmem>>, vector<128x128xf32>
    %cst = arith.constant dense<0.000000e+00> : vector<16x128xf32>
    %6 = tpu.matmul %4, %5, %cst {dimension_numbers = #tpu.dot_dimension_numbers<[1], [0], [0], [1], [0, 0, 1, 1], [], []>} : vector<16x128xf32>, vector<128x128xf32>, vector<16x128xf32> -> vector<16x128xf32>
    %7 = arith.addf %3, %6 : vector<16x128xf32>
    %c0_6 = arith.constant 0 : index
    %c0_7 = arith.constant 0 : index
    %8 = vector.load %arg5[%c0_6, %c0_7] : memref<16x128xf32, #tpu.memory_space<vmem>>, vector<16x128xf32>
    tpu.vector_store %arg5[%c0_6, %c0_7], %7 {strides = array<i32>} : memref<16x128xf32, #tpu.memory_space<vmem>>, vector<16x128xf32>,
    %c0_i32_8 = arith.constant 0 : i32
    %9 = arith.cmpi eq, %arg1, %c0_i32_8 : i32
    %10 = arith.extui %9 : i1 to i32
    %c0_i32_9 = arith.constant 0 : i32
    %11 = arith.cmpi ne, %10, %c0_i32_9 : i32
    scf.if %11 {
      %c0_10 = arith.constant 0 : index
      %c0_11 = arith.constant 0 : index
      %12 = vector.load %arg5[%c0_10, %c0_11] : memref<16x128xf32, #tpu.memory_space<vmem>>, vector<16x128xf32>
      %c0_12 = arith.constant 0 : index
      %c0_13 = arith.constant 0 : index
      %13 = vector.load %arg4[%c0_12, %c0_13] : memref<16x128xf32, #tpu.memory_space<vmem>>, vector<16x128xf32>
      tpu.vector_store %arg4[%c0_12, %c0_13], %12 {strides = array<i32>} : memref<16x128xf32, #tpu.memory_space<vmem>>, vector<16x128xf32>,
    } else {
    }
    return
  }
  func.func @transform_0(%arg0: i32, %arg1: i32) -> (i32, i32) {
    %c0_i32 = arith.constant 0 : i32
    return %arg0, %arg1 : i32, i32
  }
  func.func @transform_1(%arg0: i32, %arg1: i32) -> (i32, i32) {
    %c0_i32 = arith.constant 0 : i32
    %c0_i32_0 = arith.constant 0 : i32
    return %arg1, %c0_i32 : i32, i32
  }
  func.func @transform_2(%arg0: i32, %arg1: i32) -> (i32, i32) {
    %c0_i32 = arith.constant 0 : i32
    %c0_i32_0 = arith.constant 0 : i32
    return %arg0, %c0_i32 : i32, i32
  }
}

</mosaic_0001>

<bundles_post_ra>
// kernel: tpu_custom_call.1
= control target key start
LH: loop header
LB: loop body
LE: loop exit
PB: predicated region body
PF: predicated region fallthrough
CT: control target
= control target key end

     0   :  { %7 = vsyncpa [#allocation4], 0  ;;  %s261_s0 = inlined_call_operand.hbm [shape: f32[16,128], index: 0, kind: input, shape index: {}]   ;;  %s262_s1 = inlined_call_operand.hbm [shape: f32[128,128], index: 1, kind: input, shape index: {}]   ;;  %s263_s2 = inlined_call_operand.hbm [shape: f32[16,128], index: 2, kind: output, shape index: {}]  }
   0x1   :  { %8 = vsyncpa [#allocation7], 0 }
   0x2   :  { %9 = vsyncpa [#allocation5], 0  ;;  %s14_s11 = sshll.u32 %s261_s0, 4  ;;  %s223_s12 = smov [#allocation3]   ;;  %s15_s11 = int_to_ptr.hbm [resolvable:$true] %s14_s11 }
   0x3   :  { %s16_s13 = sshll.u32 %s223_s12, 4  ;;  %s27_s16 = sshll.u32 %s262_s1, 4  ;;  %s17_s13 = int_to_ptr.vmem [resolvable:$true] %s16_s13  ;;  %s28_s16 = int_to_ptr.hbm [resolvable:$true] %s27_s16 }
   0x4   :  { %s224_s17 = smov 128   ;;  %s225_s18 = smov 8  }
   0x5   :  { %22 = dma.hbm_to_vmem [thread:$0]  %s15_s11, 256, %s17_s13, [#allocation4], %s224_s17, %s224_s17, %s225_s18  }
   0x6   :  { %s226_s19 = smov [#allocation6]  }
   0x7   :  { %s29_s20 = sshll.u32 %s226_s19, 4  ;;  %s30_s20 = int_to_ptr.vmem [resolvable:$true] %s29_s20 }
   0x8   :  { %35 = dma.hbm_to_vmem [thread:$0]  %s28_s16, 2048, %s30_s20, [#allocation7], %s224_s17, %s224_s17, %s225_s18  }
   0x9   :  { %217 = dma.done.wait [#allocation4], 256  }
   0xa   :  { %218 = vsyncadd [#allocation4], 4294967040 }
   0xb   :  { %219 = dma.done.wait [#allocation7], 2048  }
   0xc   :  { %220 = vsyncadd [#allocation7], 4294965248  ;;  %v69_v0 = vld [vmem:[#allocation6 + $0x78] sm:$0xff]  ;;  %v68_v1 = vld [vmem:[#allocation6 + $0x70] sm:$0xff]  ;;  %s227_s0 = smov [#allocation8]   ;;  %s110_s23 = sshll.u32 %s263_s2, 4  ;;  %s111_s23 = int_to_ptr.hbm [resolvable:$true] %s110_s23 }
   0xd   :  { %70 = vmatpush.msra.mxu0 %v69_v0  ;;  %124 = vmatpush.msra.mxu1 %v69_v0  ;;  %v67_v2 = vld [vmem:[#allocation6 + $0x68] sm:$0xff]  ;;  %v66_v3 = vld [vmem:[#allocation6 + $0x60] sm:$0xff]  ;;  %v65_v4 = vld [vmem:[#allocation6 + $0x58] sm:$0xff]  ;;  %s108_s1 = sshll.u32 %s227_s0, 4  ;;  %s109_s1 = int_to_ptr.vmem [resolvable:$true] %s108_s1 }
   0xe   :  { %v64_v5 = vld [vmem:[#allocation6 + $0x50] sm:$0xff]  ;;  %v63_v6 = vld [vmem:[#allocation6 + $0x48] sm:$0xff]  ;;  %v62_v7 = vld [vmem:[#allocation6 + $0x40] sm:$0xff] }
   0xf   :  { %71 = vmatpush.msra.mxu0 %v68_v1  ;;  %125 = vmatpush.msra.mxu1 %v68_v1  ;;  %v61_v8 = vld [vmem:[#allocation6 + $0x38] sm:$0xff]  ;;  %v60_v9 = vld [vmem:[#allocation6 + $0x30] sm:$0xff]  ;;  %v59_v10 = vld [vmem:[#allocation6 + $0x28] sm:$0xff] }
  0x10   :  { %v58_v11 = vld [vmem:[#allocation6 + $0x20] sm:$0xff]  ;;  %v57_v12 = vld [vmem:[#allocation6 + $0x18] sm:$0xff]  ;;  %v56_v13 = vld [vmem:[#allocation6 + $0x10] sm:$0xff] }
  0x11   :  { %72 = vmatpush.msra.mxu0 %v67_v2  ;;  %126 = vmatpush.msra.mxu1 %v67_v2  ;;  %v55_v14 = vld [vmem:[#allocation6 + $0x8] sm:$0xff]  ;;  %v54_v15 = vld [vmem:[#allocation6] sm:$0xff]  ;;  %v52_v16 = vld [vmem:[#allocation3] sm:$0xff] }
  0x12   :  { %v53_v17 = vld [vmem:[#allocation3 + $0x8] sm:$0xff] }
  0x13   :  { %73 = vmatpush.msra.mxu0 %v66_v3  ;;  %127 = vmatpush.msra.mxu1 %v66_v3 }
  0x15   :  { %74 = vmatpush.msra.mxu0 %v65_v4  ;;  %128 = vmatpush.msra.mxu1 %v65_v4 }
  0x17   :  { %75 = vmatpush.msra.mxu0 %v64_v5  ;;  %129 = vmatpush.msra.mxu1 %v64_v5 }
  0x19   :  { %76 = vmatpush.msra.mxu0 %v63_v6  ;;  %130 = vmatpush.msra.mxu1 %v63_v6 }
  0x1b   :  { %77 = vmatpush.msra.mxu0 %v62_v7  ;;  %131 = vmatpush.msra.mxu1 %v62_v7 }
  0x1d   :  { %78 = vmatpush.msra.mxu0 %v61_v8  ;;  %132 = vmatpush.msra.mxu1 %v61_v8 }
  0x1f   :  { %79 = vmatpush.msra.mxu0 %v60_v9  ;;  %133 = vmatpush.msra.mxu1 %v60_v9 }
  0x21   :  { %80 = vmatpush.msra.mxu0 %v59_v10  ;;  %134 = vmatpush.msra.mxu1 %v59_v10 }
  0x23   :  { %81 = vmatpush.msra.mxu0 %v58_v11  ;;  %135 = vmatpush.msra.mxu1 %v58_v11 }
  0x25   :  { %82 = vmatpush.msra.mxu0 %v57_v12  ;;  %136 = vmatpush.msra.mxu1 %v57_v12 }
  0x27   :  { %83 = vmatpush.msra.mxu0 %v56_v13  ;;  %137 = vmatpush.msra.mxu1 %v56_v13 }
  0x29   :  { %84 = vmatpush.msra.mxu0 %v55_v14  ;;  %138 = vmatpush.msra.mxu1 %v55_v14 }
  0x2b   :  { %85 = vmatpush.msra.mxu0 %v54_v15  ;;  %139 = vmatpush.msra.mxu1 %v54_v15 }
  0x2c   :  { %86 = vmatmul.f32.vlgmr.msra.gmra.mxu0 %v52_v16  ;;  %89 = vmatmul.f32.vlgmr.msra.gmra.mxu1 %v53_v17 }
  0xa9   :  { %v87_v18 = vpop.f32.mrf.mxu0  ;;  %v90_v19 = vpop.f32.mrf.mxu1 }
  0xaa   :  { %102 = vst [vmem:[#allocation8] sm:$0xff] %v87_v18 }
  0xab   :  { %103 = vst [vmem:[#allocation8 + $0x8] sm:$0xff] %v90_v19 }
  0xac   :  { %116 = dma.vmem_to_hbm [thread:$0]  %s109_s1, 256, %s111_s23, [#allocation5], %s224_s17, %s224_s17, %s225_s18  }
  0xad   :  { %221 = dma.done.wait [#allocation5], 256  }
  0xae   :  { %222 = vsyncadd [#allocation5], 4294967040 }
  0xaf   :  { %121 = vsyncpa [#allocation4], 1 }
  0xb0   :  { %122 = vsyncpa [#allocation7], 1 }
  0xb1   :  { %123 = vsyncpa [#allocation5], 1 }

</bundles_post_ra>
